<compile_context>
chip_gen: v6e
topology: v6e:2x2x1
jax: 0.10.0
libtpu: 0.0.40
codegen_flags: <defaults>
</compile_context>

<pallas_src>
import functools

import jax
import jax.numpy as jnp
from jax import lax
from jax.experimental import pallas as pl
from jax.experimental.pallas import tpu as pltpu


def _fold_rows(a):
    """Reduce (rows, lanes) -> (8, lanes) with a balanced tree of vreg-row adds (VPU only)."""
    rows, lanes = a.shape
    if rows % 8 != 0:
        # Tiny-batch path (rows < 8 by construction): sublane-reduce once and park the
        # result in sublane 0 of the (8, lanes) accumulator block.
        col = jnp.sum(a, axis=0, keepdims=True)                      # (1, lanes)
        sub = lax.broadcasted_iota(jnp.int32, (8, lanes), 0)
        return jnp.where(sub == 0, col, 0.0)
    parts = [a[r:r + 8, :] for r in range(0, rows, 8)]
    while len(parts) > 1:
        nxt = [parts[j] + parts[j + 1] for j in range(0, len(parts) - 1, 2)]
        if len(parts) % 2:
            nxt.append(parts[-1])
        parts = nxt
    return parts[0]


def _ce_kernel(x_ref, lab_ref, pick_ref, segsum_ref, task_ref, out_ref, *,
               num_classes, batch, batch_tile, tiles_per_shard, mask_rows):
    s = pl.program_id(0)   # shard axis (CORE_PARALLEL on v7x, size 1 elsewhere)
    i = pl.program_id(1)   # batch-tile axis ("arbitrary" reduction axis)

    # Output block index depends only on s -> resident across i; use it as the accumulator.
    @pl.when(i == 0)
    def _init():
        out_ref[...] = jnp.zeros_like(out_ref)

    x = x_ref[...].astype(jnp.float32)            # (tb, L) with L = T*C, batch on sublanes
    tb, L = x.shape
    inv_c = 1.0 / num_classes

    # --- per-task max, fully in-lane -----------------------------------------------------
    # 1) sliding-window max of width C via static circular rolls (window never wraps for
    #    segment-start lanes), 2) broadcast each segment-start value across its segment
    #    with a 0/1 matmul (MXU slot is otherwise idle).  Any constant-per-segment shift is
    #    algebraically exact in logsumexp, so DEFAULT matmul precision is fine here.
    m = x
    covered = 1
    while covered < num_classes:
        step = min(covered, num_classes - covered)
        m = jnp.maximum(m, pltpu.roll(m, shift=(L - step) % L, axis=1))
        covered += step
    m_full = jnp.dot(m, pick_ref[...], preferred_element_type=jnp.float32)

    # --- numerically stable per-task logsumexp, broadcast over each segment --------------
    e = jnp.exp(x - m_full)
    s_full = jnp.dot(e, segsum_ref[...], precision=lax.Precision.HIGHEST,
                     preferred_element_type=jnp.float32)
    lse_full = m_full + jnp.log(s_full)           # >= m_full (s_full >= 1), never -inf

    # --- gather the label logit -----------------------------------------------------------
    # Broadcast the (tb, T) labels across their C-lane segment via a tiny matmul, then
    # compare against the per-lane class id.  Labels are exact through a bf16 MXU pass for
    # C <= 256; use HIGHEST otherwise.
    lab = lab_ref[...].astype(jnp.float32)
    if num_classes > 256:
        lab_full = jnp.dot(lab, task_ref[...], precision=lax.Precision.HIGHEST,
                           preferred_element_type=jnp.float32)
    else:
        lab_full = jnp.dot(lab, task_ref[...], preferred_element_type=jnp.float32)
    cls = (lax.broadcasted_iota(jnp.int32, (1, L), 1) % num_classes).astype(jnp.float32)
    picked = jnp.where(lab_full == cls, x, 0.0)

    # sum over lanes+rows of `contrib` == sum_t nll[b, t] summed over the tile's samples.
    contrib = lse_full * inv_c - picked           # (tb, L)

    if mask_rows:
        row_start = (s * tiles_per_shard + i) * batch_tile
        full_tile = row_start + batch_tile <= batch

        @pl.when(full_tile)
        def _acc_full():
            out_ref[...] += _fold_rows(contrib)

        @pl.when(jnp.logical_not(full_tile))
        def _acc_tail():
            rows = lax.broadcasted_iota(jnp.int32, (tb, 1), 0)
            valid = (row_start + rows) < batch    # also zeroes shard-overhang tiles
            out_ref[...] += _fold_rows(jnp.where(valid, contrib, 0.0))
    else:
        out_ref[...] += _fold_rows(contrib)


def _auto_num_shards():
    # Only v7x-class chips have two TensorCores per chip worth sharding over.
    try:
        kind = jax.devices()[0].device_kind.lower()
    except Exception:
        return 1
    return 2 if "v7" in kind else 1


def _pick_batch_tile(batch, lanes, in_itemsize, batch_tile):
    # VMEM budget: ~9 f32 temporaries per element plus the double-buffered input block;
    # keeps the working set well inside v7x's 32 MiB scoped default (64 MiB physical).
    budget = 24 * 1024 * 1024
    per_row = lanes * (4 * 9 + 2 * in_itemsize)
    cap = max(8, budget // max(per_row, 1))
    tb = min(int(batch_tile), cap, batch)
    if tb >= 8:
        tb = (tb // 8) * 8                        # keep the row fold on vreg boundaries
    return max(1, tb)


def multi_label_softmax_loss(outputs, labels, *, batch_tile=1024, num_shards=None,
                             vmem_limit_bytes=None):
    """outputs: (B, T, C) float logits, labels: (B, T) int -> scalar float32 loss.

    Labels must lie in [0, C) (no ignore_index handling)."""
    B, T, C = outputs.shape
    if B == 0 or T == 0:
        return jnp.zeros((), jnp.float32)
    L = T * C

    x2d = outputs.reshape(B, L)                   # zero-cost contiguous view, no relayout
    lab = labels.astype(jnp.int32)                # (B, T), natural layout

    tb = _pick_batch_tile(B, L, jnp.dtype(outputs.dtype).itemsize, batch_tile)
    total_tiles = -(-B // tb)

    ns = num_shards if num_shards is not None else _auto_num_shards()
    ns = max(1, min(int(ns), total_tiles))
    tiles_per_shard = -(-total_tiles // ns)
    overhang = ns * tiles_per_shard != total_tiles
    needs_mask = (B % tb != 0) or overhang

    # Tiny 0/1 broadcast matrices (DMA'd once; their block index never changes).
    lane = jnp.arange(L, dtype=jnp.int32)
    seg = lane // C
    pick_mat = (lane[:, None] == (seg * C)[None, :]).astype(jnp.float32)     # (L, L)
    segsum_mat = (seg[:, None] == seg[None, :]).astype(jnp.float32)          # (L, L)
    task_mat = (jnp.arange(T, dtype=jnp.int32)[:, None] == seg[None, :]
                ).astype(jnp.float32)                                        # (T, L)

    def tile_idx(s, i):
        t = s * tiles_per_shard + i
        if overhang:
            t = jnp.minimum(t, total_tiles - 1)   # overhang steps re-read the last tile
        return t                                  # ...and are fully masked in the kernel

    kernel = functools.partial(
        _ce_kernel, num_classes=C, batch=B, batch_tile=tb,
        tiles_per_shard=tiles_per_shard, mask_rows=needs_mask)

    if ns > 1 and getattr(pltpu, "CORE_PARALLEL", None) is not None:
        dims = (pltpu.CORE_PARALLEL, getattr(pltpu, "ARBITRARY", "arbitrary"))
    else:
        dims = ("parallel", "arbitrary")
    cp_kwargs = dict(dimension_semantics=dims)
    if vmem_limit_bytes is not None:
        cp_kwargs["vmem_limit_bytes"] = vmem_limit_bytes

    partials = pl.pallas_call(
        kernel,
        out_shape=jax.ShapeDtypeStruct((ns * 8, L), jnp.float32),
        grid=(ns, tiles_per_shard),
        in_specs=[
            pl.BlockSpec((tb, L), lambda s, i: (tile_idx(s, i), 0)),
            pl.BlockSpec((tb, T), lambda s, i: (tile_idx(s, i), 0)),
            pl.BlockSpec((L, L), lambda s, i: (0, 0)),
            pl.BlockSpec((L, L), lambda s, i: (0, 0)),
            pl.BlockSpec((T, L), lambda s, i: (0, 0)),
        ],
        out_specs=pl.BlockSpec((8, L), lambda s, i: (s, 0)),
        compiler_params=pltpu.CompilerParams(**cp_kwargs),
    )(x2d, lab, pick_mat, segsum_mat, task_mat)

    # Sum the FULL per-shard blocks (deferred reduction) and apply the 1/B mean here.
    return jnp.sum(partials) * (1.0 / B)


def _reference_loss(outputs, labels):
    logp = jax.nn.log_softmax(outputs.astype(jnp.float32), axis=-1)
    nll = -jnp.take_along_axis(logp, labels[:, :, None].astype(jnp.int32), axis=-1)[..., 0]
    return jnp.sum(jnp.mean(nll, axis=0))


if __name__ == "__main__":
    key = jax.random.PRNGKey(0)

    # (B, T, C, dtype): single-tile, ragged multi-tile, large multi-tile bf16 (+ sharding
    # on v7x), alternative task/class splits, and the tiny-batch fallback path.
    cases = [
        (8,    4, 32, jnp.float32),
        (300,  4, 32, jnp.float32),
        (2500, 4, 32, jnp.bfloat16),
        (64,   2, 64, jnp.float32),
        (96,   8, 16, jnp.float32),
        (5,    4, 32, jnp.float32),
    ]
    for idx, (B, T, C, dtype) in enumerate(cases):
        k_logits, k_labels = jax.random.split(jax.random.fold_in(key, idx))
        outputs = (jax.random.normal(k_logits, (B, T, C), dtype=jnp.float32) * 3.0
                   ).astype(dtype)
        labels = jax.random.randint(k_labels, (B, T), 0, C, dtype=jnp.int32)

        loss = jax.block_until_ready(multi_label_softmax_loss(outputs, labels))
        ref = jax.block_until_ready(_reference_loss(outputs, labels))
        assert jnp.allclose(loss, ref, rtol=2e-4, atol=2e-4), \
            (B, T, C, str(dtype), float(loss), float(ref))

    print("KERNEL_OK")
</pallas_src>

<mosaic_0001>
module attributes {stable_mosaic.version = 11 : i64} {
  func.func @_ce_kernel(%arg0: i32, %arg1: i32, %arg2: memref<8x128xf32, #tpu.memory_space<vmem>>, %arg3: memref<8x4xi32, #tpu.memory_space<vmem>>, %arg4: memref<128x128xf32, #tpu.memory_space<vmem>>, %arg5: memref<128x128xf32, #tpu.memory_space<vmem>>, %arg6: memref<4x128xf32, #tpu.memory_space<vmem>>, %arg7: memref<8x128xf32, #tpu.memory_space<vmem>>) attributes {dimension_semantics = [#tpu.dimension_semantics<parallel>, #tpu.dimension_semantics<arbitrary>], iteration_bounds = array<i64: 1, 1>, scalar_prefetch = 0 : i64, scratch_operands = 0 : i64, tpu.core_type = #tpu.core_type<tc>, window_params = [{transform_indices = @transform_0, window_bounds = array<i64: 8, 128>}, {transform_indices = @transform_1, window_bounds = array<i64: 8, 4>}, {pipeline_mode = #tpu.pipeline_mode<synchronous>, transform_indices = @transform_2, window_bounds = array<i64: 128, 128>}, {pipeline_mode = #tpu.pipeline_mode<synchronous>, transform_indices = @transform_3, window_bounds = array<i64: 128, 128>}, {pipeline_mode = #tpu.pipeline_mode<synchronous>, transform_indices = @transform_4, window_bounds = array<i64: 4, 128>}, {transform_indices = @transform_5, window_bounds = array<i64: 8, 128>}]} {
    %c0_i32 = arith.constant 0 : i32
    %0 = arith.cmpi eq, %arg1, %c0_i32 : i32
    %1 = arith.extui %0 : i1 to i32
    %c0_i32_0 = arith.constant 0 : i32
    %2 = arith.cmpi ne, %1, %c0_i32_0 : i32
    scf.if %2 {
      %cst_22 = arith.constant 0.000000e+00 : f32
      %54 = vector.broadcast %cst_22 : f32 to vector<8x128xf32>
      %c0_23 = arith.constant 0 : index
      %c0_24 = arith.constant 0 : index
      %55 = vector.load %arg7[%c0_23, %c0_24] : memref<8x128xf32, #tpu.memory_space<vmem>>, vector<8x128xf32>
      tpu.vector_store %arg7[%c0_23, %c0_24], %54 {strides = array<i32>} : memref<8x128xf32, #tpu.memory_space<vmem>>, vector<8x128xf32>,
    } else {
    }
    %c0 = arith.constant 0 : index
    %c0_1 = arith.constant 0 : index
    %3 = vector.load %arg2[%c0, %c0_1] : memref<8x128xf32, #tpu.memory_space<vmem>>, vector<8x128xf32>
    %c127_i32 = arith.constant 127 : i32
    %4 = tpu.dynamic_rotate %3 by %c127_i32 dim 1 : vector<8x128xf32>, i32 -> vector<8x128xf32>
    %5 = arith.maximumf %3, %4 : vector<8x128xf32>
    %c126_i32 = arith.constant 126 : i32
    %6 = tpu.dynamic_rotate %5 by %c126_i32 dim 1 : vector<8x128xf32>, i32 -> vector<8x128xf32>
    %7 = arith.maximumf %5, %6 : vector<8x128xf32>
    %c124_i32 = arith.constant 124 : i32
    %8 = tpu.dynamic_rotate %7 by %c124_i32 dim 1 : vector<8x128xf32>, i32 -> vector<8x128xf32>
    %9 = arith.maximumf %7, %8 : vector<8x128xf32>
    %c120_i32 = arith.constant 120 : i32
    %10 = tpu.dynamic_rotate %9 by %c120_i32 dim 1 : vector<8x128xf32>, i32 -> vector<8x128xf32>
    %11 = arith.maximumf %9, %10 : vector<8x128xf32>
    %c112_i32 = arith.constant 112 : i32
    %12 = tpu.dynamic_rotate %11 by %c112_i32 dim 1 : vector<8x128xf32>, i32 -> vector<8x128xf32>
    %13 = arith.maximumf %11, %12 : vector<8x128xf32>
    %c0_2 = arith.constant 0 : index
    %c0_3 = arith.constant 0 : index
    %14 = vector.load %arg4[%c0_2, %c0_3] : memref<128x128xf32, #tpu.memory_space<vmem>>, vector<128x128xf32>
    %cst = arith.constant dense<0.000000e+00> : vector<8x128xf32>
    %15 = tpu.matmul %13, %14, %cst {dimension_numbers = #tpu.dot_dimension_numbers<[1], [0], [0], [1], [0, 0, 1, 1], [], []>} : vector<8x128xf32>, vector<128x128xf32>, vector<8x128xf32> -> vector<8x128xf32>
    %16 = arith.subf %3, %15 : vector<8x128xf32>
    %17 = math.exp %16 : vector<8x128xf32>
    %c0_4 = arith.constant 0 : index
    %c0_5 = arith.constant 0 : index
    %18 = vector.load %arg5[%c0_4, %c0_5] : memref<128x128xf32, #tpu.memory_space<vmem>>, vector<128x128xf32>
    %cst_6 = arith.constant dense<0.000000e+00> : vector<8x128xf32>
    %19 = tpu.matmul %17, %18, %cst_6 {dimension_numbers = #tpu.dot_dimension_numbers<[1], [0], [0], [1], [0, 0, 1, 1], [], []>, precision = #tpu.contract_precision<fp32>} : vector<8x128xf32>, vector<128x128xf32>, vector<8x128xf32> -> vector<8x128xf32>
    %20 = math.log %19 : vector<8x128xf32>
    %21 = arith.addf %15, %20 : vector<8x128xf32>
    %c0_7 = arith.constant 0 : index
    %c0_8 = arith.constant 0 : index
    %22 = vector.load %arg3[%c0_7, %c0_8] : memref<8x4xi32, #tpu.memory_space<vmem>>, vector<8x4xi32>
    %23 = arith.sitofp %22 : vector<8x4xi32> to vector<8x4xf32>
    %c0_9 = arith.constant 0 : index
    %c0_10 = arith.constant 0 : index
    %24 = vector.load %arg6[%c0_9, %c0_10] : memref<4x128xf32, #tpu.memory_space<vmem>>, vector<4x128xf32>
    %cst_11 = arith.constant dense<0.000000e+00> : vector<8x128xf32>
    %25 = tpu.matmul %23, %24, %cst_11 {dimension_numbers = #tpu.dot_dimension_numbers<[1], [0], [0], [1], [0, 0, 1, 1], [], []>} : vector<8x4xf32>, vector<4x128xf32>, vector<8x128xf32> -> vector<8x128xf32>
    %26 = tpu.iota {dimensions = array<i32: 1>} : vector<1x128xi32>
    %c32_i32 = arith.constant 32 : i32
    %c0_i32_12 = arith.constant 0 : i32
    %27 = arith.cmpi eq, %c32_i32, %c0_i32_12 : i32
    %c1_i32 = arith.constant 1 : i32
    %28 = arith.select %27, %c1_i32, %c32_i32 : i32
    %29 = vector.broadcast %28 : i32 to vector<1x128xi32>
    %30 = arith.remsi %26, %29 : vector<1x128xi32>
    %c0_i32_13 = arith.constant 0 : i32
    %31 = vector.broadcast %c0_i32_13 : i32 to vector<1x128xi32>
    %32 = arith.cmpi ne, %30, %31 : vector<1x128xi32>
    %c0_i32_14 = arith.constant 0 : i32
    %33 = vector.broadcast %c0_i32_14 : i32 to vector<1x128xi32>
    %34 = arith.cmpi slt, %30, %33 : vector<1x128xi32>
    %c0_i32_15 = arith.constant 0 : i32
    %35 = arith.cmpi slt, %28, %c0_i32_15 : i32
    %36 = vector.broadcast %35 : i1 to vector<1x128xi1>
    %37 = vector.broadcast %36 : vector<1x128xi1> to vector<1x128xi1>
    %38 = arith.xori %34, %37 : vector<1x128xi1>
    %39 = arith.andi %38, %32 : vector<1x128xi1>
    %40 = vector.broadcast %28 : i32 to vector<1x128xi32>
    %41 = arith.addi %30, %40 : vector<1x128xi32>
    %42 = arith.select %39, %41, %30 : vector<1x128xi1>, vector<1x128xi32>
    %43 = arith.sitofp %42 : vector<1x128xi32> to vector<1x128xf32>
    %44 = vector.broadcast %43 : vector<1x128xf32> to vector<8x128xf32>
    %45 = arith.cmpf oeq, %25, %44 : vector<8x128xf32>
    %cst_16 = arith.constant 0.000000e+00 : f32
    %46 = vector.broadcast %cst_16 : f32 to vector<8x128xf32>
    %47 = arith.select %45, %3, %46 : vector<8x128xi1>, vector<8x128xf32>
    %cst_17 = arith.constant 3.125000e-02 : f32
    %48 = vector.broadcast %cst_17 : f32 to vector<8x128xf32>
    %49 = arith.mulf %21, %48 : vector<8x128xf32>
    %50 = arith.subf %49, %47 : vector<8x128xf32>
    %c0_18 = arith.constant 0 : index
    %c0_19 = arith.constant 0 : index
    %51 = vector.load %arg7[%c0_18, %c0_19] : memref<8x128xf32, #tpu.memory_space<vmem>>, vector<8x128xf32>
    %52 = arith.addf %51, %50 : vector<8x128xf32>
    %c0_20 = arith.constant 0 : index
    %c0_21 = arith.constant 0 : index
    %53 = vector.load %arg7[%c0_20, %c0_21] : memref<8x128xf32, #tpu.memory_space<vmem>>, vector<8x128xf32>
    tpu.vector_store %arg7[%c0_20, %c0_21], %52 {strides = array<i32>} : memref<8x128xf32, #tpu.memory_space<vmem>>, vector<8x128xf32>,
    return
  }
  func.func @transform_0(%arg0: i32, %arg1: i32) -> (i32, i32) {
    %c1_i32 = arith.constant 1 : i32
    %0 = arith.muli %arg0, %c1_i32 : i32
    %1 = arith.addi %0, %arg1 : i32
    %c0_i32 = arith.constant 0 : i32
    %c0_i32_0 = arith.constant 0 : i32
    return %1, %c0_i32 : i32, i32
  }
  func.func @transform_1(%arg0: i32, %arg1: i32) -> (i32, i32) {
    %c1_i32 = arith.constant 1 : i32
    %0 = arith.muli %arg0, %c1_i32 : i32
    %1 = arith.addi %0, %arg1 : i32
    %c0_i32 = arith.constant 0 : i32
    %c0_i32_0 = arith.constant 0 : i32
    return %1, %c0_i32 : i32, i32
  }
  func.func @transform_2(%arg0: i32, %arg1: i32) -> (i32, i32) {
    %c0_i32 = arith.constant 0 : i32
    %c0_i32_0 = arith.constant 0 : i32
    %c0_i32_1 = arith.constant 0 : i32
    return %c0_i32, %c0_i32_0 : i32, i32
  }
  func.func @transform_3(%arg0: i32, %arg1: i32) -> (i32, i32) {
    %c0_i32 = arith.constant 0 : i32
    %c0_i32_0 = arith.constant 0 : i32
    %c0_i32_1 = arith.constant 0 : i32
    return %c0_i32, %c0_i32_0 : i32, i32
  }
  func.func @transform_4(%arg0: i32, %arg1: i32) -> (i32, i32) {
    %c0_i32 = arith.constant 0 : i32
    %c0_i32_0 = arith.constant 0 : i32
    %c0_i32_1 = arith.constant 0 : i32
    return %c0_i32, %c0_i32_0 : i32, i32
  }
  func.func @transform_5(%arg0: i32, %arg1: i32) -> (i32, i32) {
    %c0_i32 = arith.constant 0 : i32
    %c0_i32_0 = arith.constant 0 : i32
    return %arg0, %c0_i32 : i32, i32
  }
}

</mosaic_0001>

<bundles_post_ra>
// kernel: tpu_custom_call.1
= control target key start
LH: loop header
LB: loop body
LE: loop exit
PB: predicated region body
PF: predicated region fallthrough
CT: control target
= control target key end

     0   :  { %10 = vsyncpa [#allocation3], 0  ;;  %s1889_s0 = inlined_call_operand.vmem [shape: f32[8,128], index: 0, kind: input, shape index: {}]   ;;  %s1890_s1 = inlined_call_operand.vmem [shape: s32[8,4], index: 1, kind: input, shape index: {}]   ;;  %s1891_s2 = inlined_call_operand.hbm [shape: f32[128,128], index: 2, kind: input, shape index: {}]   ;;  %s1892_s3 = inlined_call_operand.hbm [shape: f32[128,128], index: 3, kind: input, shape index: {}]   ;;  %s1893_s4 = inlined_call_operand.vmem [shape: f32[4,128], index: 4, kind: input, shape index: {}]   ;;  %s1894_s5 = inlined_call_operand.hbm [shape: f32[8,128], index: 5, kind: output, shape index: {}]  }
   0x1   :  { %11 = vsyncpa [#allocation6], 0 }
   0x2   :  { %12 = vsyncpa [#allocation4], 0  ;;  %s1439_s18 = smov [#allocation2]  }
   0x3   :  { %s34_s19 = sshll.u32 %s1439_s18, 4  ;;  %s35_s19 = int_to_ptr.vmem [resolvable:$true] %s34_s19 }
   0x4   :  { %s1381_s20 = scalar_lea.vmem %s35_s19, 2048  ;;  %p1386_p1 = scmp.lt.s32.totalorder %s35_s19, %s35_s19 }
   0x5   :  { %p1382_p0 = scmp.ne.s32.totalorder %s35_s19, %s1381_s20  ;;  %p1387_p2 = scmp.lt.s32.totalorder %s1381_s20, %s1381_s20 }
   0x7   :  { %p1388_p3 = por %p1387_p2, %p1386_p1 }
   0x9   :  { %p1389_p4 = pnand %p1388_p3, %p1382_p0 }
   0xb   :  { %1392 = shalt.err (!%p1389_p4)
}
   0xc   :  { %s1440_s21 = smov 128   ;;  %s1441_s22 = smov 8  }
   0xd   :  { %40 = dma.hbm_to_vmem [thread:$0]  %s1891_s2, 2048, %s35_s19, [#allocation3], %s1440_s21, %s1440_s21, %s1441_s22  }
   0xe   :  { %s1442_s25 = smov [#allocation5]  }
   0xf   :  { %s46_s26 = sshll.u32 %s1442_s25, 4  ;;  %s47_s26 = int_to_ptr.vmem [resolvable:$true] %s46_s26 }
  0x10   :  { %s1401_s27 = scalar_lea.vmem %s47_s26, 2048  ;;  %p1406_p6 = scmp.lt.s32.totalorder %s47_s26, %s47_s26 }
  0x11   :  { %p1402_p5 = scmp.ne.s32.totalorder %s47_s26, %s1401_s27  ;;  %p1407_p7 = scmp.lt.s32.totalorder %s1401_s27, %s1401_s27 }
  0x13   :  { %p1408_p8 = por %p1407_p7, %p1406_p6 }
  0x15   :  { %p1409_p9 = pnand %p1408_p8, %p1402_p5 }
  0x17   :  { %1412 = shalt.err (!%p1409_p9)
}
  0x18   :  { %52 = dma.hbm_to_vmem [thread:$0]  %s1892_s3, 2048, %s47_s26, [#allocation6], %s1440_s21, %s1440_s21, %s1441_s22  }
  0x19   :  { %1433 = dma.done.wait [#allocation3], 2048  }
  0x1a   :  { %1434 = vsyncadd [#allocation3], 4294965248 }
  0x1b   :  { %1435 = dma.done.wait [#allocation6], 2048  }
  0x1c   :  { %1436 = vsyncadd [#allocation6], 4294965248  ;;  %v1490_v0 = vld [vmem:[%s1889_s0] sm:$0xff]  ;;  %s1443_s6 = smov 127   ;;  %s1444_s7 = smov 126   ;;  %v119_v5 = vld [vmem:[#allocation2 + $0x78] sm:$0xff] }
  0x1d   :  { %89 = vrot.lane.b32.xlu0 %v1490_v0, %s1443_s6  ;;  %s1445_s3 = smov 124   ;;  %v1446_v6 = vmov 0.0   ;;  %v118_v7 = vld [vmem:[#allocation2 + $0x70] sm:$0xff]  ;;  %v117_v8 = vld [vmem:[#allocation2 + $0x68] sm:$0xff]  ;;  %v116_v9 = vld [vmem:[#allocation2 + $0x60] sm:$0xff]  ;;  %s1447_s0 = smov 120  }
  0x1e   :  { %1107 = vmatprep.subr.mxu0 %v1446_v6  ;;  %1142 = vmatprep.subr.mxu1 %v1446_v6  ;;  %v115_v10 = vld [vmem:[#allocation2 + $0x58] sm:$0xff]  ;;  %v114_v13 = vld [vmem:[#allocation2 + $0x50] sm:$0xff]  ;;  %v113_v14 = vld [vmem:[#allocation2 + $0x48] sm:$0xff]  ;;  %vm1448_vm0 = vmmov 0   ;;  %s1449_s8 = smov 112   ;;  %vm860_vm1 = vcmask 1043456  }
  0x1f   :  { %1108 = vmatpush3.msra.mxu0 %v119_v5  ;;  %v112_v15 = vld [vmem:[#allocation2 + $0x40] sm:$0xff]  ;;  %v111_v16 = vld [vmem:[#allocation2 + $0x38] sm:$0xff]  ;;  %v110_v17 = vld [vmem:[#allocation2 + $0x30] sm:$0xff]  ;;  %1139 = vmatprep.mubr.msk.f32.mxu0 %vm1448_vm0, %v1446_v6  ;;  %vm856_vm2 = vcmask 31744  }
  0x20   :  { %1109 = vmatprep.subr.mxu0 %v1446_v6  ;;  %v109_v18 = vld [vmem:[#allocation2 + $0x28] sm:$0xff]  ;;  %v108_v19 = vld [vmem:[#allocation2 + $0x20] sm:$0xff]  ;;  %v107_v20 = vld [vmem:[#allocation2 + $0x18] sm:$0xff]  ;;  %1174 = vmatprep.mubr.msk.f32.mxu1 %vm1448_vm0, %v1446_v6 }
  0x21   :  { %1110 = vmatpush3.msra.mxu0 %v118_v7  ;;  %v106_v21 = vld [vmem:[#allocation2 + $0x10] sm:$0xff]  ;;  %v105_v22 = vld [vmem:[#allocation2 + $0x8] sm:$0xff]  ;;  %v104_v23 = vld [vmem:[#allocation2] sm:$0xff] }
  0x22   :  { %1111 = vmatprep.subr.mxu0 %v1446_v6  ;;  %v208_v24 = vld [vmem:[#allocation5 + $0x78] sm:$0xff]  ;;  %v207_v26 = vld [vmem:[#allocation5 + $0x70] sm:$0xff]  ;;  %v206_v28 = vld [vmem:[#allocation5 + $0x68] sm:$0xff] }
  0x23   :  { %1112 = vmatpush3.msra.mxu0 %v117_v8  ;;  %v1516_v25 = vand.u32 4294901760, %v208_v24  ;;  %v1518_v27 = vand.u32 4294901760, %v207_v26  ;;  %v1522_v29 = vand.u32 4294901760, %v206_v28  ;;  %v205_v30 = vld [vmem:[#allocation5 + $0x60] sm:$0xff]  ;;  %v204_v33 = vld [vmem:[#allocation5 + $0x58] sm:$0xff]  ;;  %v203_v36 = vld [vmem:[#allocation5 + $0x50] sm:$0xff] }
  0x24   :  { %1113 = vmatprep.subr.mxu0 %v1446_v6  ;;  %v1526_v31 = vand.u32 4294901760, %v205_v30  ;;  %v1531_v35 = vand.u32 4294901760, %v204_v33  ;;  %v1534_v37 = vand.u32 4294901760, %v203_v36  ;;  %v200_v7 = vld [vmem:[#allocation5 + $0x38] sm:$0xff] }
  0x25   :  { %1114 = vmatpush3.msra.mxu0 %v116_v9  ;;  %1143 = vmatpush3.msra.mxu1 %v1516_v25  ;;  %v1541_v38 = vsub.f32 %v208_v24, %v1516_v25  ;;  %v1544_v39 = vsub.f32 %v207_v26, %v1518_v27  ;;  %v1548_v41 = vsub.f32 %v206_v28, %v1522_v29 }
  0x26   :  { %1115 = vmatprep.subr.mxu0 %v1446_v6  ;;  %1144 = vmatprep.subr.mxu1 %v1446_v6  ;;  %v1552_v43 = vsub.f32 %v205_v30, %v1526_v31  ;;  %v1559_v46 = vsub.f32 %v204_v33, %v1531_v35  ;;  %v1566_v49 = vsub.f32 %v203_v36, %v1534_v37 }
  0x27   :  { %1116 = vmatpush3.msra.mxu0 %v115_v10  ;;  %1145 = vmatpush3.msra.mxu1 %v1518_v27  ;;  %v303_v40 = vand.u32 4294901760, %v1541_v38  ;;  %v310_v42 = vand.u32 4294901760, %v1544_v39  ;;  %v317_v45 = vand.u32 4294901760, %v1548_v41  ;;  %v1603_v10 = vand.u32 4294901760, %v200_v7 }
  0x28   :  { %1117 = vmatprep.subr.mxu0 %v1446_v6  ;;  %1146 = vmatprep.subr.mxu1 %v1446_v6  ;;  %v324_v48 = vand.u32 4294901760, %v1552_v43  ;;  %v331_v53 = vand.u32 4294901760, %v1559_v46  ;;  %v338_v57 = vand.u32 4294901760, %v1566_v49 }
  0x29   :  { %1118 = vmatpush3.msra.mxu0 %v114_v13  ;;  %1147 = vmatpush3.msra.mxu1 %v1522_v29  ;;  %v304_v44 = vsub.f32 %v1541_v38, %v303_v40  ;;  %v311_v47 = vsub.f32 %v1544_v39, %v310_v42  ;;  %v318_v52 = vsub.f32 %v1548_v41, %v317_v45 }
  0x2a   :  { %1119 = vmatprep.subr.mxu0 %v1446_v6  ;;  %1148 = vmatprep.subr.mxu1 %v1446_v6  ;;  %v325_v56 = vsub.f32 %v1552_v43, %v324_v48  ;;  %v332_v59 = vsub.f32 %v1559_v46, %v331_v53  ;;  %v339_v61 = vsub.f32 %v1566_v49, %v338_v57 }
  0x2b   :  { %1120 = vmatpush3.msra.mxu0 %v113_v14  ;;  %1149 = vmatpush3.msra.mxu1 %v1526_v31  ;;  %v305_v51 = vand.u32 4294901760, %v304_v44  ;;  %v312_v55 = vand.u32 4294901760, %v311_v47  ;;  %v319_v58 = vand.u32 4294901760, %v318_v52  ;;  %v1612_v14 = vsub.f32 %v200_v7, %v1603_v10 }
  0x2c   :  { %1121 = vmatprep.subr.mxu0 %v1446_v6  ;;  %1150 = vmatprep.subr.mxu1 %v1446_v6  ;;  %v326_v60 = vand.u32 4294901760, %v325_v56  ;;  %v333_v62 = vand.u32 4294901760, %v332_v59  ;;  %v340_v63 = vand.u32 4294901760, %v339_v61  ;;  %v194_v56 = vld [vmem:[#allocation5 + $0x8] sm:$0xff] }
  0x2d   :  { %1122 = vmatpush3.msra.mxu0 %v112_v15  ;;  %1151 = vmatpush3.msra.mxu1 %v1531_v35 }
  0x2e   :  { %1123 = vmatprep.subr.mxu0 %v1446_v6  ;;  %1152 = vmatprep.subr.mxu1 %v1446_v6 }
  0x2f   :  { %1124 = vmatpush3.msra.mxu0 %v111_v16  ;;  %1153 = vmatpush3.msra.mxu1 %v1534_v37  ;;  %v198_v16 = vld [vmem:[#allocation5 + $0x28] sm:$0xff] }
  0x30   :  { %1125 = vmatprep.subr.mxu0 %v1446_v6  ;;  %1154 = vmatprep.subr.mxu1 %v1446_v6 }
  0x31   :  { %1126 = vmatpush3.msra.mxu0 %v110_v17 }
  0x32   :  { %1127 = vmatprep.subr.mxu0 %v1446_v6 }
  0x33   :  { %1128 = vmatpush3.msra.mxu0 %v109_v18 }
  0x34   :  { %1129 = vmatprep.subr.mxu0 %v1446_v6 }
  0x35   :  { %1130 = vmatpush3.msra.mxu0 %v108_v19  ;;  %v359_v19 = vand.u32 4294901760, %v1612_v14 }
  0x36   :  { %1131 = vmatprep.subr.mxu0 %v1446_v6 }
  0x37   :  { %1132 = vmatpush3.msra.mxu0 %v107_v20  ;;  %v360_v24 = vsub.f32 %v1612_v14, %v359_v19 }
  0x38   :  { %1133 = vmatprep.subr.mxu0 %v1446_v6 }
  0x39   :  { %1134 = vmatpush3.msra.mxu0 %v106_v21  ;;  %v1626_v21 = vand.u32 4294901760, %v198_v16  ;;  %v361_v33 = vand.u32 4294901760, %v360_v24 }
  0x3a   :  { %1135 = vmatprep.subr.mxu0 %v1446_v6 }
  0x3b   :  { %1136 = vmatpush3.msra.mxu0 %v105_v22  ;;  %v197_v22 = vld [vmem:[#allocation5 + $0x20] sm:$0xff]  ;;  %v1637_v30 = vsub.f32 %v198_v16, %v1626_v21 }
  0x3c   :  { %1137 = vmatprep.subr.mxu0 %v1446_v6  ;;  %v1633_v28 = vand.u32 4294901760, %v197_v22 }
  0x3d   :  { %1138 = vmatpush3.msra.mxu0 %v104_v23  ;;  %v373_v47 = vand.u32 4294901760, %v1637_v30 }
  0x3e   :  { %1177 = vmatprep.subr.mxu0 %v1446_v6  ;;  %v1644_v36 = vsub.f32 %v197_v22, %v1633_v28 }
  0x3f   :  { %v374_v59 = vsub.f32 %v1637_v30, %v373_v47 }
  0x40   :  { %v380_v52 = vand.u32 4294901760, %v1644_v36 }
  0x8f   :  { %v90_v1 = vpop.permute.xlu0 %89 }
  0x90   :  { %v91_v2 = vmax.f32 %v1490_v0, %v90_v1  ;;  %v202_v1 = vld [vmem:[#allocation5 + $0x48] sm:$0xff] }
  0x92   :  { %92 = vrot.lane.b32.xlu0 %v91_v2, %s1444_s7 }
 0x104   :  { %v93_v3 = vpop.permute.xlu0 %92 }
 0x105   :  { %v94_v4 = vmax.f32 %v91_v2, %v93_v3  ;;  %v1590_v2 = vand.u32 4294901760, %v202_v1  ;;  %v201_v3 = vld [vmem:[#allocation5 + $0x40] sm:$0xff] }
 0x106   :  { %v1595_v5 = vand.u32 4294901760, %v201_v3 }
 0x107   :  { %95 = vrot.lane.b32.xlu1 %v94_v4, %s1445_s3  ;;  %1155 = vmatpush3.msra.mxu1 %v1590_v2 }
 0x108   :  { %1156 = vmatprep.subr.mxu1 %v1446_v6  ;;  %v1601_v9 = vsub.f32 %v201_v3, %v1595_v5  ;;  %v375_v3 = vand.u32 4294901760, %v374_v59 }
 0x109   :  { %1157 = vmatpush3.msra.mxu1 %v1595_v5 }
 0x10a   :  { %1158 = vmatprep.subr.mxu1 %v1446_v6  ;;  %v352_v13 = vand.u32 4294901760, %v1601_v9 }
 0x10b   :  { %1159 = vmatpush3.msra.mxu1 %v1603_v10 }
 0x10c   :  { %1160 = vmatprep.subr.mxu1 %v1446_v6  ;;  %v353_v18 = vsub.f32 %v1601_v9, %v352_v13 }
 0x10e   :  { %v354_v23 = vand.u32 4294901760, %v353_v18 }
 0x179   :  { %v96_v11 = vpop.permute.xlu1 %95 }
 0x17a   :  { %v97_v12 = vmax.f32 %v94_v4, %v96_v11  ;;  %v1593_v4 = vsub.f32 %v202_v1, %v1590_v2  ;;  %v199_v11 = vld [vmem:[#allocation5 + $0x30] sm:$0xff] }
 0x17b   :  { %v1614_v15 = vand.u32 4294901760, %v199_v11 }
 0x17c   :  { %98 = vrot.lane.b32.xlu1 %v97_v12, %s1447_s0  ;;  %v345_v8 = vand.u32 4294901760, %v1593_v4 }
 0x17d   :  { %v1623_v20 = vsub.f32 %v199_v11, %v1614_v15  ;;  %1161 = vmatpush3.msra.mxu1 %v1614_v15 }
 0x17e   :  { %1162 = vmatprep.subr.mxu1 %v1446_v6 }
 0x17f   :  { %v366_v26 = vand.u32 4294901760, %v1623_v20  ;;  %1163 = vmatpush3.msra.mxu1 %v1626_v21 }
 0x180   :  { %1164 = vmatprep.subr.mxu1 %v1446_v6 }
 0x181   :  { %1165 = vmatpush3.msra.mxu1 %v1633_v28 }
 0x182   :  { %1166 = vmatprep.subr.mxu1 %v1446_v6 }
 0x1ee   :  { %v99_v32 = vpop.permute.xlu1 %98 }
 0x1ef   :  { %v100_v34 = vmax.f32 %v97_v12, %v99_v32  ;;  %v346_v12 = vsub.f32 %v1593_v4, %v345_v8  ;;  %v196_v32 = vld [vmem:[#allocation5 + $0x18] sm:$0xff] }
 0x1f0   :  { %v1646_v44 = vand.u32 4294901760, %v196_v32 }
 0x1f1   :  { %101 = vrot.lane.b32.xlu0 %v100_v34, %s1449_s8  ;;  %v347_v17 = vand.u32 4294901760, %v346_v12 }
 0x1f2   :  { %1167 = vmatpush3.msra.mxu1 %v1646_v44 }
 0x1f3   :  { %1168 = vmatprep.subr.mxu1 %v1446_v6 }
 0x263   :  { %v102_v50 = vpop.permute.xlu0 %101 }
 0x264   :  { %v103_v54 = vmax.f32 %v100_v34, %v102_v50  ;;  %v367_v34 = vsub.f32 %v1623_v20, %v366_v26  ;;  %v195_v50 = vld [vmem:[#allocation5 + $0x10] sm:$0xff] }
 0x266   :  { %1140 = vmatmul.mubr.f32.vlgmr.msra.gmra.mxu0 %v103_v54  ;;  %v1654_v54 = vsub.f32 %v196_v32, %v1646_v44 }
 0x267   :  { %1178 = vmatpush3.msra.mxu0 %v305_v51  ;;  %1209 = vmatprep.mubr.msk.f32.mxu0 %vm1448_vm0, %v1446_v6  ;;  %v368_v51 = vand.u32 4294901760, %v367_v34 }
 0x268   :  { %1179 = vmatprep.subr.mxu0 %v1446_v6 }
 0x269   :  { %1180 = vmatpush3.msra.mxu0 %v312_v55  ;;  %v1656_v55 = vand.u32 4294901760, %v195_v50 }
 0x26a   :  { %1181 = vmatprep.subr.mxu0 %v1446_v6 }
 0x26b   :  { %1182 = vmatpush3.msra.mxu0 %v319_v58  ;;  %v193_v58 = vld [vmem:[#allocation5] sm:$0xff]  ;;  %v1673_v1 = vsub.f32 %v195_v50, %v1656_v55  ;;  %1169 = vmatpush3.msra.mxu1 %v1656_v55 }
 0x26c   :  { %1183 = vmatprep.subr.mxu0 %v1446_v6  ;;  %v1665_v61 = vand.u32 4294901760, %v193_v58  ;;  %1170 = vmatprep.subr.mxu1 %v1446_v6 }
 0x26d   :  { %1184 = vmatpush3.msra.mxu0 %v326_v60  ;;  %v1663_v60 = vand.u32 4294901760, %v194_v56 }
 0x26e   :  { %1185 = vmatprep.subr.mxu0 %v1446_v6  ;;  %v1681_v11 = vsub.f32 %v193_v58, %v1665_v61 }
 0x26f   :  { %1186 = vmatpush3.msra.mxu0 %v333_v62  ;;  %v381_v62 = vsub.f32 %v1644_v36, %v380_v52  ;;  %v1678_v7 = vsub.f32 %v194_v56, %v1663_v60  ;;  %1171 = vmatpush3.msra.mxu1 %v1663_v60 }
 0x270   :  { %1187 = vmatprep.subr.mxu0 %v1446_v6  ;;  %v408_v22 = vand.u32 4294901760, %v1681_v11  ;;  %1172 = vmatprep.subr.mxu1 %v1446_v6 }
 0x271   :  { %1188 = vmatpush3.msra.mxu0 %v340_v63  ;;  %v387_v63 = vand.u32 4294901760, %v1654_v54  ;;  %v382_v12 = vand.u32 4294901760, %v381_v62  ;;  %v401_v18 = vand.u32 4294901760, %v1678_v7  ;;  %1173 = vmatpush3.msra.mxu1 %v1665_v61 }
 0x272   :  { %1189 = vmatprep.subr.mxu0 %v1446_v6  ;;  %1212 = vmatprep.subr.mxu1 %v1446_v6 }
 0x273   :  { %1190 = vmatpush3.msra.mxu0 %v347_v17  ;;  %v388_v16 = vsub.f32 %v1654_v54, %v387_v63  ;;  %v394_v17 = vand.u32 4294901760, %v1673_v1  ;;  %v402_v32 = vsub.f32 %v1678_v7, %v401_v18 }
 0x274   :  { %1191 = vmatprep.subr.mxu0 %v1446_v6 }
 0x275   :  { %1192 = vmatpush3.msra.mxu0 %v354_v23  ;;  %v389_v23 = vand.u32 4294901760, %v388_v16  ;;  %v395_v24 = vsub.f32 %v1673_v1, %v394_v17  ;;  %v403_v50 = vand.u32 4294901760, %v402_v32 }
 0x276   :  { %1193 = vmatprep.subr.mxu0 %v1446_v6 }
 0x277   :  { %1194 = vmatpush3.msra.mxu0 %v361_v33  ;;  %v409_v33 = vsub.f32 %v1681_v11, %v408_v22  ;;  %v396_v34 = vand.u32 4294901760, %v395_v24 }
 0x278   :  { %1195 = vmatprep.subr.mxu0 %v1446_v6 }
 0x279   :  { %1196 = vmatpush3.msra.mxu0 %v368_v51  ;;  %v410_v51 = vand.u32 4294901760, %v409_v33 }
 0x27a   :  { %1197 = vmatprep.subr.mxu0 %v1446_v6 }
 0x27b   :  { %1198 = vmatpush3.msra.mxu0 %v375_v3 }
 0x27c   :  { %1199 = vmatprep.subr.mxu0 %v1446_v6 }
 0x27d   :  { %1200 = vmatpush3.msra.mxu0 %v382_v12 }
 0x27e   :  { %1201 = vmatprep.subr.mxu0 %v1446_v6 }
 0x27f   :  { %1202 = vmatpush3.msra.mxu0 %v389_v23 }
 0x280   :  { %1203 = vmatprep.subr.mxu0 %v1446_v6 }
 0x281   :  { %1204 = vmatpush3.msra.mxu0 %v396_v34 }
 0x282   :  { %1205 = vmatprep.subr.mxu0 %v1446_v6 }
 0x283   :  { %1206 = vmatpush3.msra.mxu0 %v403_v50 }
 0x284   :  { %1207 = vmatprep.subr.mxu0 %v1446_v6 }
 0x285   :  { %1208 = vmatpush3.msra.mxu0 %v410_v51 }
 0x286   :  { %1247 = vmatprep.subr.mxu0 %v1446_v6 }
 0x326   :  { %v1710_v56 = vpop.f32.mrf.mxu0 }
 0x327   :  { %v190_v58 = vsub.f32 %v1490_v0, %v1710_v56 }
 0x328   :  { %v1141_v59 = vpop.f32.mrf.mxu0 }
 0x329   :  { %v191_v62 = vmul.f32 1.442695, %v190_v58 }
 0x32b   :  { %1369 = vpow2.f32 %v191_v62 }
 0x338   :  { %v1370_v3 = vpop.eup %1369 }
 0x339   :  { %v1714_v12 = vand.u32 4294901760, %v1370_v3 }
 0x33b   :  { %1210 = vmatmul.mubr.f32.vlgmr.msra.gmra.mxu0 %v1714_v12  ;;  %v1718_v16 = vsub.f32 %v1370_v3, %v1714_v12 }
 0x33c   :  { %1248 = vmatpush3.msra.mxu0 %v1516_v25  ;;  %1279 = vmatprep.mubr.msk.f32.mxu0 %vm1448_vm0, %v1446_v6 }
 0x33d   :  { %1249 = vmatprep.subr.mxu0 %v1446_v6  ;;  %v292_v23 = vand.u32 4294901760, %v1718_v16 }
 0x33e   :  { %1250 = vmatpush3.msra.mxu0 %v1518_v27 }
 0x33f   :  { %1251 = vmatprep.subr.mxu0 %v1446_v6  ;;  %v293_v24 = vsub.f32 %v1718_v16, %v292_v23 }
 0x340   :  { %1252 = vmatpush3.msra.mxu0 %v1522_v29 }
 0x341   :  { %1253 = vmatprep.subr.mxu0 %v1446_v6  ;;  %v294_v32 = vand.u32 4294901760, %v293_v24 }
 0x342   :  { %1254 = vmatpush3.msra.mxu0 %v1526_v31 }
 0x343   :  { %1255 = vmatprep.subr.mxu0 %v1446_v6  ;;  %1175 = vmatmul.mubr.f32.vlgmr.msra.gmra.mxu1 %v294_v32 }
 0x344   :  { %1213 = vmatpush3.msra.mxu1 %v1541_v38  ;;  %1256 = vmatpush3.msra.mxu0 %v1531_v35 }
 0x345   :  { %1214 = vmatprep.subr.mxu1 %v1446_v6  ;;  %1257 = vmatprep.subr.mxu0 %v1446_v6 }
 0x346   :  { %1215 = vmatpush3.msra.mxu1 %v1544_v39  ;;  %1258 = vmatpush3.msra.mxu0 %v1534_v37 }
 0x347   :  { %1216 = vmatprep.subr.mxu1 %v1446_v6  ;;  %1259 = vmatprep.subr.mxu0 %v1446_v6 }
 0x348   :  { %1217 = vmatpush3.msra.mxu1 %v1548_v41  ;;  %1260 = vmatpush3.msra.mxu0 %v1590_v2 }
 0x349   :  { %1218 = vmatprep.subr.mxu1 %v1446_v6  ;;  %1261 = vmatprep.subr.mxu0 %v1446_v6 }
 0x34a   :  { %1219 = vmatpush3.msra.mxu1 %v1552_v43  ;;  %1262 = vmatpush3.msra.mxu0 %v1595_v5 }
 0x34b   :  { %1220 = vmatprep.subr.mxu1 %v1446_v6  ;;  %1263 = vmatprep.subr.mxu0 %v1446_v6 }
 0x34c   :  { %1221 = vmatpush3.msra.mxu1 %v1559_v46  ;;  %1264 = vmatpush3.msra.mxu0 %v1603_v10 }
 0x34d   :  { %1222 = vmatprep.subr.mxu1 %v1446_v6  ;;  %1265 = vmatprep.subr.mxu0 %v1446_v6 }
 0x34e   :  { %1223 = vmatpush3.msra.mxu1 %v1566_v49  ;;  %1266 = vmatpush3.msra.mxu0 %v1614_v15 }
 0x34f   :  { %1224 = vmatprep.subr.mxu1 %v1446_v6  ;;  %1267 = vmatprep.subr.mxu0 %v1446_v6 }
 0x350   :  { %1225 = vmatpush3.msra.mxu1 %v1593_v4  ;;  %1268 = vmatpush3.msra.mxu0 %v1626_v21 }
 0x351   :  { %1226 = vmatprep.subr.mxu1 %v1446_v6  ;;  %1269 = vmatprep.subr.mxu0 %v1446_v6 }
 0x352   :  { %1227 = vmatpush3.msra.mxu1 %v1601_v9  ;;  %1270 = vmatpush3.msra.mxu0 %v1633_v28 }
 0x353   :  { %1228 = vmatprep.subr.mxu1 %v1446_v6  ;;  %1271 = vmatprep.subr.mxu0 %v1446_v6 }
 0x354   :  { %1229 = vmatpush3.msra.mxu1 %v1612_v14  ;;  %1272 = vmatpush3.msra.mxu0 %v1646_v44 }
 0x355   :  { %1230 = vmatprep.subr.mxu1 %v1446_v6  ;;  %1273 = vmatprep.subr.mxu0 %v1446_v6 }
 0x356   :  { %1231 = vmatpush3.msra.mxu1 %v1623_v20  ;;  %1274 = vmatpush3.msra.mxu0 %v1656_v55 }
 0x357   :  { %1232 = vmatprep.subr.mxu1 %v1446_v6  ;;  %1275 = vmatprep.subr.mxu0 %v1446_v6 }
 0x358   :  { %1233 = vmatpush3.msra.mxu1 %v1637_v30  ;;  %1276 = vmatpush3.msra.mxu0 %v1663_v60 }
 0x359   :  { %1234 = vmatprep.subr.mxu1 %v1446_v6  ;;  %1277 = vmatprep.subr.mxu0 %v1446_v6 }
 0x35a   :  { %1235 = vmatpush3.msra.mxu1 %v1644_v36  ;;  %1278 = vmatpush3.msra.mxu0 %v1665_v61 }
 0x35b   :  { %1236 = vmatprep.subr.mxu1 %v1446_v6  ;;  %1280 = vmatmul.mubr.f32.vlgmr.msra.gmra.mxu0 %v292_v23 }
 0x35c   :  { %1317 = vmatprep.subr.mxu0 %v1446_v6  ;;  %1237 = vmatpush3.msra.mxu1 %v1654_v54 }
 0x35d   :  { %1318 = vmatpush3.msra.mxu0 %v1516_v25  ;;  %1238 = vmatprep.subr.mxu1 %v1446_v6  ;;  %v853_v25 = vld [vmem:[%s1890_s1] sm:$0xff]  ;;  %s1450_s1 = smov [#allocation7]  }
 0x35e   :  { %1319 = vmatprep.subr.mxu0 %v1446_v6  ;;  %1239 = vmatpush3.msra.mxu1 %v1673_v1 }
 0x35f   :  { %1320 = vmatpush3.msra.mxu0 %v1518_v27  ;;  %1240 = vmatprep.subr.mxu1 %v1446_v6  ;;  %v855_v27 = vld [vmem:[%s1893_s4] sm:$0xf]  ;;  %s962_s4 = sshll.u32 %s1450_s1, 4  ;;  %s963_s4 = int_to_ptr.vmem [resolvable:$true] %s962_s4 }
 0x360   :  { %1321 = vmatprep.subr.mxu0 %v1446_v6  ;;  %1241 = vmatpush3.msra.mxu1 %v1678_v7  ;;  %s1413_s13 = scalar_lea.vmem %s963_s4, 128  ;;  %p1418_p11 = scmp.lt.s32.totalorder %s963_s4, %s963_s4 }
 0x361   :  { %1322 = vmatpush3.msra.mxu0 %v1522_v29  ;;  %1242 = vmatprep.subr.mxu1 %v1446_v6  ;;  %v854_v29 = vcvt.s32.f32 %v853_v25  ;;  %p1414_p10 = scmp.ne.s32.totalorder %s963_s4, %s1413_s13  ;;  %p1419_p12 = scmp.lt.s32.totalorder %s1413_s13, %s1413_s13 }
 0x362   :  { %1323 = vmatprep.subr.mxu0 %v1446_v6  ;;  %1243 = vmatpush3.msra.mxu1 %v1681_v11 }
 0x363   :  { %1244 = vmatprep.mubr.msk.f32.mxu1 %vm1448_vm0, %v1446_v6  ;;  %1324 = vmatpush3.msra.mxu0 %v1526_v31  ;;  %p1420_p13 = por %p1419_p12, %p1418_p11 }
 0x364   :  { %1245 = vmatmul.mubr.f32.vlgmr.msra.gmra.mxu1 %v1718_v16  ;;  %1282 = vmatprep.subr.mxu1 %v1446_v6 }
 0x365   :  { %1325 = vmatprep.subr.mxu0 %v1446_v6  ;;  %1283 = vmatpush3.msra.mxu1 %v303_v40  ;;  %p1421_p0 = pnand %p1420_p13, %p1414_p10 }
 0x366   :  { %1326 = vmatpush3.msra.mxu0 %v1531_v35  ;;  %1284 = vmatprep.subr.mxu1 %v1446_v6 }
 0x367   :  { %1327 = vmatprep.subr.mxu0 %v1446_v6  ;;  %1285 = vmatpush3.msra.mxu1 %v310_v42 }
 0x368   :  { %1328 = vmatpush3.msra.mxu0 %v1534_v37  ;;  %1286 = vmatprep.subr.mxu1 %v1446_v6 }
 0x369   :  { %1329 = vmatprep.subr.mxu0 %v1446_v6  ;;  %1287 = vmatpush3.msra.mxu1 %v317_v45 }
 0x36a   :  { %1330 = vmatpush3.msra.mxu0 %v1590_v2  ;;  %1288 = vmatprep.subr.mxu1 %v1446_v6 }
 0x36b   :  { %1331 = vmatprep.subr.mxu0 %v1446_v6  ;;  %1289 = vmatpush3.msra.mxu1 %v324_v48 }
 0x36c   :  { %1332 = vmatpush3.msra.mxu0 %v1595_v5  ;;  %1290 = vmatprep.subr.mxu1 %v1446_v6 }
 0x36d   :  { %1333 = vmatprep.subr.mxu0 %v1446_v6  ;;  %1291 = vmatpush3.msra.mxu1 %v331_v53 }
 0x36e   :  { %1334 = vmatpush3.msra.mxu0 %v1603_v10  ;;  %1292 = vmatprep.subr.mxu1 %v1446_v6 }
 0x36f   :  { %1335 = vmatprep.subr.mxu0 %v1446_v6  ;;  %1293 = vmatpush3.msra.mxu1 %v338_v57 }
 0x370   :  { %1336 = vmatpush3.msra.mxu0 %v1614_v15  ;;  %1294 = vmatprep.subr.mxu1 %v1446_v6 }
 0x371   :  { %1337 = vmatprep.subr.mxu0 %v1446_v6  ;;  %1295 = vmatpush3.msra.mxu1 %v345_v8 }
 0x372   :  { %1338 = vmatpush3.msra.mxu0 %v1626_v21  ;;  %1296 = vmatprep.subr.mxu1 %v1446_v6 }
 0x373   :  { %1339 = vmatprep.subr.mxu0 %v1446_v6  ;;  %1297 = vmatpush3.msra.mxu1 %v352_v13 }
 0x374   :  { %1340 = vmatpush3.msra.mxu0 %v1633_v28  ;;  %1298 = vmatprep.subr.mxu1 %v1446_v6 }
 0x375   :  { %1341 = vmatprep.subr.mxu0 %v1446_v6  ;;  %1299 = vmatpush3.msra.mxu1 %v359_v19 }
 0x376   :  { %1342 = vmatpush3.msra.mxu0 %v1646_v44  ;;  %1300 = vmatprep.subr.mxu1 %v1446_v6 }
 0x377   :  { %1343 = vmatprep.subr.mxu0 %v1446_v6  ;;  %1301 = vmatpush3.msra.mxu1 %v366_v26 }
 0x378   :  { %1344 = vmatpush3.msra.mxu0 %v1656_v55  ;;  %1302 = vmatprep.subr.mxu1 %v1446_v6 }
 0x379   :  { %1345 = vmatprep.subr.mxu0 %v1446_v6  ;;  %1303 = vmatpush3.msra.mxu1 %v373_v47 }
 0x37a   :  { %1346 = vmatpush3.msra.mxu0 %v1663_v60  ;;  %1304 = vmatprep.subr.mxu1 %v1446_v6 }
 0x37b   :  { %1347 = vmatprep.subr.mxu0 %v1446_v6  ;;  %1305 = vmatpush3.msra.mxu1 %v380_v52 }
 0x37c   :  { %1348 = vmatpush3.msra.mxu0 %v1665_v61  ;;  %1349 = vmatprep.mubr.msk.f32.mxu0 %vm1448_vm0, %v1446_v6 }
 0x37d   :  { %1306 = vmatprep.subr.mxu1 %v1446_v6  ;;  %1350 = vmatmul.mubr.f32.vlgmr.msra.gmra.mxu0 %v1714_v12 }
 0x37e   :  { %1307 = vmatpush3.msra.mxu1 %v387_v63  ;;  %1314 = vmatprep.mubr.msk.f32.mxu1 %vm1448_vm0, %v1446_v6 }
 0x37f   :  { %1308 = vmatprep.subr.mxu1 %v1446_v6 }
 0x380   :  { %1309 = vmatpush3.msra.mxu1 %v394_v17 }
 0x381   :  { %1310 = vmatprep.subr.mxu1 %v1446_v6 }
 0x382   :  { %1311 = vmatpush3.msra.mxu1 %v401_v18 }
 0x383   :  { %1312 = vmatprep.subr.mxu1 %v1446_v6 }
 0x384   :  { %1313 = vmatpush3.msra.mxu1 %v408_v22 }
 0x385   :  { %1315 = vmatmul.mubr.f32.vlgmr.msra.gmra.mxu1 %v1714_v12  ;;  %1352 = vmatprep.subr.mxu1 %v1446_v6 }
 0x386   :  { %1353 = vmatpush3.msk.msra.mxu1 %vm860_vm1, %v855_v27  ;;  %1354 = vmatprep.mubr.msk.f32.mxu1 %vm1448_vm0, %v1446_v6  ;;  %v934_v6 = vlaneseq }
 0x388   :  { %v935_v9 = vand.u32 127, %v934_v6 }
 0x389   :  { %1355 = vmatmul.mubr.msk.f32.vlgmr.msra.gmra.mxu1 %vm856_vm2, %v854_v29 }
 0x38a   :  { %v940_v10 = vand.u32 31, %v935_v9 }
 0x38c   :  { %v948_v13 = vcvt.s32.f32 %v940_v10 }
 0x3fb   :  { %v447_v31 = vpop.f32.mrf.mxu0 }
 0x3fd   :  { %v1211_v35 = vpop.f32.mrf.mxu0 }
 0x403   :  { %v296_v37 = vpop.f32.mrf.mxu1 }
 0x404   :  { %v448_v45 = vadd.f32 %v447_v31, %v296_v37 }
 0x405   :  { %v1176_v38 = vpop.f32.mrf.mxu1 }
 0x41b   :  { %v640_v39 = vpop.f32.mrf.mxu0 }
 0x41d   :  { %v1281_v40 = vpop.f32.mrf.mxu0 }
 0x424   :  { %v551_v41 = vpop.f32.mrf.mxu1 }
 0x425   :  { %v552_v48 = vadd.f32 %v551_v41, %v448_v45 }
 0x426   :  { %v1246_v42 = vpop.f32.mrf.mxu1 }
 0x427   :  { %v641_v49 = vadd.f32 %v640_v39, %v552_v48 }
 0x43d   :  { %v846_v43 = vpop.f32.mrf.mxu0 }
 0x43f   :  { %v1351_v46 = vpop.f32.mrf.mxu0 }
 0x445   :  { %v759_v53 = vpop.f32.mrf.mxu1 }
 0x446   :  { %v760_v57 = vadd.f32 %v759_v53, %v641_v49 }
 0x447   :  { %v1316_v2 = vpop.f32.mrf.mxu1 }
 0x448   :  { %v847_v4 = vadd.f32 %v846_v43, %v760_v57 }
 0x449   :  { %v930_v5 = vpop.f32.mrf.mxu1 }
 0x44a   :  { %1371 = vlog2.f32 %v847_v4  ;;  %vm949_vm3 = vcmp.eq.f32.partialorder %v930_v5, %v948_v13 }
 0x44b   :  { %v1356_v8 = vpop.f32.mrf.mxu1  ;;  %v950_v20 = vsel %vm949_vm3, %v1490_v0, 0.0 }
 0x457   :  { %v1372_v14 = vpop.eup %1371 }
 0x458   :  { %v851_v15 = vmul.f32 0.6931472, %v1372_v14 }
 0x45a   :  { %v852_v19 = vadd.f32 %v851_v15, %v1710_v56 }
 0x45c   :  { %v951_v21 = vmul.f32 0.03125, %v852_v19 }
 0x45e   :  { %v952_v26 = vsub.f32 %v951_v21, %v950_v20 }
 0x460   :  { %955 = vst [vmem:[#allocation7] sm:$0xff] %v952_v26 }
 0x461   :  { %1424 = shalt.err (!%p1421_p0)
}
 0x462   :  { %965 = dma.vmem_to_hbm [thread:$0]  %s963_s4, 128, %s1894_s5, [#allocation4]  }
 0x463   :  { %1437 = dma.done.wait [#allocation4], 128  }
 0x464   :  { %1438 = vsyncadd [#allocation4], 4294967168 }
 0x465   :  { %969 = vsyncpa [#allocation3], 1 }
 0x466   :  { %970 = vsyncpa [#allocation6], 1 }
 0x467   :  { %971 = vsyncpa [#allocation4], 1 }

</bundles_post_ra>
